<compile_context>
chip_gen: v7x
topology: tpu7x:2x2x1
jax: 0.10.0
libtpu: 0.0.40
codegen_flags: <defaults>
</compile_context>

<pallas_src>
import functools

import jax
import jax.numpy as jnp
from jax.experimental import pallas as pl
from jax.experimental.pallas import tpu as pltpu


def _patch_prompter_kernel(x_ref, prompt_ref, o_ref):
    # x_ref, o_ref: [Bt, C*H*W] VMEM tiles; prompt_ref: [1, C*H*W] (broadcasts).
    o_ref[...] = x_ref[...] + prompt_ref[...]


def _build_prompt(patch, *, patch_size, prompt_size, dtype):
    """prompt = patch * mask, computed once on the [1, C, H, W] parameter."""
    _, _, H, W = patch.shape
    h_idx = jax.lax.broadcasted_iota(jnp.int32, (H, W), 0)
    w_idx = jax.lax.broadcasted_iota(jnp.int32, (H, W), 1)
    h_mod = h_idx % patch_size
    w_mod = w_idx % patch_size
    h_in_fg = (h_mod >= prompt_size) & (h_mod < patch_size - prompt_size)
    w_in_fg = (w_mod >= prompt_size) & (w_mod < patch_size - prompt_size)
    mask = jnp.where(h_in_fg & w_in_fg, 0.0, 1.0).astype(patch.dtype)
    return (patch * mask[None, None, :, :]).astype(dtype)


def _choose_batch_tile(B, row_bytes, target_bytes=4 << 20):
    """Pick images-per-step so each x/out buffer is ~target_bytes."""
    if B * row_bytes <= target_bytes:
        return B  # whole batch in one block (block dim == full array dim)
    bt = max(1, target_bytes // row_bytes)
    if bt >= B:
        return B
    # Keep the sublane (second-minor) dim a multiple of 8 for clean tiling.
    bt = max(8, (bt // 8) * 8)
    return min(bt, B)


def patch_prompter_forward(x, patch, *, patch_size, prompt_size):
    """x: [B, C, H, W], patch: [1, C, H, W] (H == W == image_size)."""
    B, C, H, W = x.shape
    assert patch.shape == (1, C, H, W)
    assert H % patch_size == 0 and W % patch_size == 0
    assert patch_size > 2 * prompt_size, "foreground region must be non-empty"

    CHW = C * H * W
    # Lane-dense flattening: last dim is C*H*W (a multiple of 128 for typical
    # image sizes; for the full-extent block below it is always legal).
    x2d = x.reshape(B, CHW)
    prompt2d = _build_prompt(
        patch, patch_size=patch_size, prompt_size=prompt_size, dtype=x.dtype
    ).reshape(1, CHW)

    row_bytes = CHW * x.dtype.itemsize
    Bt = _choose_batch_tile(B, row_bytes)
    grid = (pl.cdiv(B, Bt),)

    out2d = pl.pallas_call(
        _patch_prompter_kernel,
        out_shape=jax.ShapeDtypeStruct((B, CHW), x.dtype),
        grid=grid,
        in_specs=[
            # x: Bt images per step, lane-dense last dim.
            pl.BlockSpec((Bt, CHW), lambda b: (b, 0)),
            # prompt: constant block index -> DMA'd once, reused every step.
            pl.BlockSpec((1, CHW), lambda b: (0, 0)),
        ],
        out_specs=pl.BlockSpec((Bt, CHW), lambda b: (b, 0)),
        compiler_params=pltpu.CompilerParams(
            dimension_semantics=("parallel",),
            # Above the 16/32 MiB default scoped limits, under v7x's 64 MiB.
            vmem_limit_bytes=48 * 1024 * 1024,
        ),
    )(x2d, prompt2d)

    return out2d.reshape(B, C, H, W)


def _reference(x, patch, *, patch_size, prompt_size):
    # Pure-JAX reference mirroring the PyTorch code (pad-zeros-with-ones + tile).
    fg_size = patch_size - 2 * prompt_size
    fg = jnp.zeros((1, x.shape[1], fg_size, fg_size), x.dtype)
    fg = jnp.pad(
        fg,
        ((0, 0), (0, 0), (prompt_size, prompt_size), (prompt_size, prompt_size)),
        constant_values=1.0,
    )
    reps_h = x.shape[2] // patch_size
    reps_w = x.shape[3] // patch_size
    mask = jnp.tile(fg, (1, 1, reps_h, reps_w))
    return x + patch * mask


if __name__ == "__main__":
    # Small, module-consistent shapes: image_size=16, patch_size=8, prompt_size=2
    # -> fg_size = 8 - 2*2 = 4.  x: [2, 3, 16, 16], patch param: [1, 3, 16, 16].
    batch, channels, image_size = 2, 3, 16
    patch_size, prompt_size = 8, 2

    key = jax.random.PRNGKey(0)
    kx, kp = jax.random.split(key)
    x = jax.random.normal(kx, (batch, channels, image_size, image_size), jnp.float32)
    patch = jax.random.normal(kp, (1, channels, image_size, image_size), jnp.float32)

    fwd = jax.jit(
        functools.partial(
            patch_prompter_forward, patch_size=patch_size, prompt_size=prompt_size
        )
    )
    out = fwd(x, patch)
    out = jax.block_until_ready(out)

    ref = _reference(x, patch, patch_size=patch_size, prompt_size=prompt_size)
    assert out.shape == ref.shape
    assert jnp.allclose(out, ref, atol=1e-6), "mismatch vs reference"

    print("KERNEL_OK")
</pallas_src>

<mosaic_0001>
module attributes {stable_mosaic.version = 11 : i64} {
  func.func @_patch_prompter_kernel(%arg0: i32, %arg1: memref<2x768xf32, #tpu.memory_space<vmem>>, %arg2: memref<1x768xf32, #tpu.memory_space<vmem>>, %arg3: memref<2x768xf32, #tpu.memory_space<vmem>>) attributes {dimension_semantics = [#tpu.dimension_semantics<parallel>], iteration_bounds = array<i64: 1>, scalar_prefetch = 0 : i64, scratch_operands = 0 : i64, tpu.core_type = #tpu.core_type<tc>, window_params = [{transform_indices = @transform_0, window_bounds = array<i64: 2, 768>}, {pipeline_mode = #tpu.pipeline_mode<synchronous>, transform_indices = @transform_1, window_bounds = array<i64: 1, 768>}, {transform_indices = @transform_2, window_bounds = array<i64: 2, 768>}]} {
    %c0 = arith.constant 0 : index
    %c0_0 = arith.constant 0 : index
    %0 = vector.load %arg1[%c0, %c0_0] : memref<2x768xf32, #tpu.memory_space<vmem>>, vector<2x768xf32>
    %c0_1 = arith.constant 0 : index
    %c0_2 = arith.constant 0 : index
    %1 = vector.load %arg2[%c0_1, %c0_2] : memref<1x768xf32, #tpu.memory_space<vmem>>, vector<1x768xf32>
    %2 = vector.broadcast %1 : vector<1x768xf32> to vector<2x768xf32>
    %3 = arith.addf %0, %2 : vector<2x768xf32>
    %c0_3 = arith.constant 0 : index
    %c0_4 = arith.constant 0 : index
    %4 = vector.load %arg3[%c0_3, %c0_4] : memref<2x768xf32, #tpu.memory_space<vmem>>, vector<2x768xf32>
    tpu.vector_store %arg3[%c0_3, %c0_4], %3 {strides = array<i32>} : memref<2x768xf32, #tpu.memory_space<vmem>>, vector<2x768xf32>,
    return
  }
  func.func @transform_0(%arg0: i32) -> (i32, i32) {
    %c0_i32 = arith.constant 0 : i32
    %c0_i32_0 = arith.constant 0 : i32
    return %arg0, %c0_i32 : i32, i32
  }
  func.func @transform_1(%arg0: i32) -> (i32, i32) {
    %c0_i32 = arith.constant 0 : i32
    %c0_i32_0 = arith.constant 0 : i32
    %c0_i32_1 = arith.constant 0 : i32
    return %c0_i32, %c0_i32_0 : i32, i32
  }
  func.func @transform_2(%arg0: i32) -> (i32, i32) {
    %c0_i32 = arith.constant 0 : i32
    %c0_i32_0 = arith.constant 0 : i32
    return %arg0, %c0_i32 : i32, i32
  }
}

</mosaic_0001>

<bundles_post_ra>
// kernel: patch_prompter_forward.1
= control target key start
LH: loop header
LB: loop body
LE: loop exit
PB: predicated region body
PF: predicated region fallthrough
CT: control target
= control target key end

     0   :  { %v15_v0 = vlaneseq  ;;  %v75_v1 = vmov 1983009808   ;;  %s106_s1 = inlined_call_operand.vmem [shape: f32[1,768], index: 1, kind: input, shape index: {}]   ;;  %s107_s0 = inlined_call_operand.vmem [shape: f32[2,768], index: 0, kind: input, shape index: {}]   ;;  %s108_s2 = inlined_call_operand.vmem [shape: f32[2,768], index: 2, kind: output, shape index: {}]  }
   0x1   :  { %v42_v2 = vunpack.c.l.s4 %v75_v1  ;;  %v13_v4 = vld [vmem:[%s106_s1] sm:$0x3f]  ;;  %v12_v24 = vld [vmem:[%s107_s0 + $0x8] sm:$0xf] }
   0x2   :  { %v16_v3 = vshrl.u32 %v15_v0, 7  ;;  %v11_v25 = vld [vmem:[%s107_s0] sm:$0xff] }
   0x3   :  { %v43_v5 = vunpack.c.0.s8 %v42_v2 }
   0x4   :  { %v17_v6 = vsub.s32 0, %v16_v3  ;;  %v21_v7 = vsub.s32 1, %v16_v3  ;;  %v25_v8 = vsub.s32 2, %v16_v3  ;;  %v29_v9 = vsub.s32 3, %v16_v3 }
   0x5   :  { %v46_v10 = vsub.s32 %v43_v5, %v16_v3  ;;  %v33_v11 = vsub.s32 4, %v16_v3  ;;  %v37_v12 = vsub.s32 5, %v16_v3 }
   0x6   :  { %v18_v13 = vrot.slane %v13_v4, %v17_v6  ;;  %v22_v14 = vrot.slane %v13_v4, %v21_v7  ;;  %v26_v15 = vrot.slane %v13_v4, %v25_v8  ;;  %v30_v16 = vrot.slane %v13_v4, %v29_v9 }
   0x7   :  { %v34_v17 = vrot.slane %v13_v4, %v33_v11  ;;  %v38_v18 = vrot.slane %v13_v4, %v37_v12 }
   0x8   :  { %v39_v19 = vcombine.low %v18_v13, %v22_v14  ;;  %v40_v20 = vcombine.low %v26_v15, %v30_v16 }
   0x9   :  { %v56_v21 = vcombine.low %v34_v17, %v38_v18 }
   0xa   :  { %v47_v22 = vrot.slane %v39_v19, %v46_v10  ;;  %v54_v23 = vrot.slane %v40_v20, %v46_v10 }
   0xb   :  { %v63_v26 = vrot.slane %v56_v21, %v46_v10 }
   0xc   :  { %v55_v27 = vcombine.low %v47_v22, %v54_v23 }
   0xd   :  { %v67_v28 = vadd.f32 %v63_v26, %v12_v24 }
   0xe   :  { %v66_v29 = vadd.f32 %v55_v27, %v11_v25 }
   0xf   :  { %69 = vst [vmem:[%s108_s2 + $0x8] sm:$0xf] %v67_v28 }
  0x10   :  { %68 = vst [vmem:[%s108_s2] sm:$0xff] %v66_v29 }

</bundles_post_ra>
